<compile_context>
chip_gen: v7x
topology: tpu7x:2x2x1
jax: 0.10.0
libtpu: 0.0.40
codegen_flags: <defaults>
</compile_context>

<pallas_src>
import jax
import jax.numpy as jnp
from jax.experimental import pallas as pl
from jax.experimental.pallas import tpu as pltpu


LANE = 128      # lane width: feature/output dims padded to a multiple of this
SUBLANE = 8     # row-dim granularity


def _round_up(x, m):
    return (x + m - 1) // m * m


def encoder_kernel(x_ref, w1_ref, b1_ref, w2_ref, b2_ref, o_ref):
    mm_dtype = w1_ref.dtype                      # f32 or bf16 matmul operands
    # hidden = relu(x @ W1 + b1)   (MXU, f32 accumulation, f32 epilogue)
    h = jnp.dot(x_ref[...].astype(mm_dtype), w1_ref[...],
                preferred_element_type=jnp.float32)
    h = jnp.maximum(h + b1_ref[...], 0.0)
    # out = hidden @ W2 + b2
    out = jnp.dot(h.astype(mm_dtype), w2_ref[...],
                  preferred_element_type=jnp.float32)
    o_ref[...] = (out + b2_ref[...]).astype(o_ref.dtype)


def encoder_forward(x, w1, b1, w2, b2, *, tile_m=2048, matmul_dtype=None):
    """x: [B, S, F_in]; w1: [F_in, H]; b1: [H]; w2: [H, H]; b2: [H].

    matmul_dtype: optional dtype (e.g. jnp.bfloat16) for the MXU operands;
    accumulation / bias / ReLU stay f32.  None -> use x.dtype (exact).
    """
    B, S, F_in = x.shape
    H = w1.shape[1]
    M = B * S

    mm_dtype = jnp.dtype(matmul_dtype) if matmul_dtype is not None else jnp.dtype(x.dtype)
    in_itemsize = jnp.dtype(x.dtype).itemsize
    w_itemsize = mm_dtype.itemsize

    # Lane-dense padding of the output/hidden dim only (no-op when H % 128 == 0).
    H_pad = _round_up(H, LANE)

    # ---- Row tiling of M -------------------------------------------------
    tile_m = max(SUBLANE, _round_up(tile_m, SUBLANE))
    if M > SUBLANE:
        # At least two grid tiles so both v7x TensorCores get work.
        tile_m = min(tile_m, _round_up(pl.cdiv(M, 2), SUBLANE))
    tile_m = min(tile_m, _round_up(M, SUBLANE))

    # VMEM-budget clamp: double-buffered x/out tiles + f32 hidden + bf16 cast
    # of the hidden + resident weights must stay well inside the scoped limit.
    per_row = (2 * F_in * in_itemsize          # x tile (double-buffered)
               + H_pad * 4                     # f32 hidden intermediate
               + H_pad * w_itemsize            # hidden cast for 2nd matmul
               + 2 * H_pad * in_itemsize)      # out tile (double-buffered)
    weight_bytes = 2 * (F_in * H_pad + H_pad * H_pad) * w_itemsize + 4 * H_pad * 4
    budget = 24 * 1024 * 1024
    max_rows = max(SUBLANE, (budget - weight_bytes) // per_row)
    tile_m = max(SUBLANE, min(tile_m, max_rows // SUBLANE * SUBLANE))

    M_pad = _round_up(M, tile_m)
    n_tiles = M_pad // tile_m

    # ---- Operand prep (no feature-axis padding of x) ----------------------
    x2d = x.reshape(M, F_in)
    if M_pad != M:
        x2d = jnp.pad(x2d, ((0, M_pad - M), (0, 0)))

    w1p = w1.astype(mm_dtype)
    w2p = w2.astype(mm_dtype)
    b1p = b1.astype(jnp.float32).reshape(1, H)
    b2p = b2.astype(jnp.float32).reshape(1, H)
    if H_pad != H:
        w1p = jnp.pad(w1p, ((0, 0), (0, H_pad - H)))
        w2p = jnp.pad(w2p, ((0, H_pad - H), (0, H_pad - H)))
        b1p = jnp.pad(b1p, ((0, 0), (0, H_pad - H)))
        b2p = jnp.pad(b2p, ((0, 0), (0, H_pad - H)))

    cost = pl.CostEstimate(
        flops=2 * M_pad * H_pad * (F_in + H_pad),
        transcendentals=0,
        bytes_accessed=(M_pad * F_in * in_itemsize                 # x in
                        + (F_in * H_pad + H_pad * H_pad) * w_itemsize  # weights
                        + 2 * H_pad * 4                            # biases
                        + M_pad * H_pad * in_itemsize),            # out
    )

    out2d = pl.pallas_call(
        encoder_kernel,
        out_shape=jax.ShapeDtypeStruct((M_pad, H_pad), x.dtype),
        grid=(n_tiles,),
        in_specs=[
            pl.BlockSpec((tile_m, F_in), lambda i: (i, 0)),    # x: tiled over M, K unpadded
            pl.BlockSpec((F_in, H_pad), lambda i: (0, 0)),     # w1: VMEM-resident
            pl.BlockSpec((1, H_pad), lambda i: (0, 0)),        # b1: resident
            pl.BlockSpec((H_pad, H_pad), lambda i: (0, 0)),    # w2: resident
            pl.BlockSpec((1, H_pad), lambda i: (0, 0)),        # b2: resident
        ],
        out_specs=pl.BlockSpec((tile_m, H_pad), lambda i: (i, 0)),
        compiler_params=pltpu.CompilerParams(
            dimension_semantics=("parallel",),   # independent row tiles -> 2 TCs on v7x
            vmem_limit_bytes=32 * 1024 * 1024,   # v5e default is only 16 MiB
        ),
        cost_estimate=cost,
    )(x2d, w1p, b1p, w2p, b2p)

    # Only slice when padding was actually introduced (avoids an extra HBM copy
    # in the common H%128==0, tile_m | M case).
    if M_pad != M or H_pad != H:
        out2d = out2d[:M, :H]
    return out2d.reshape(B, S, H)


def init_params(key, input_size, hidden_size, dtype=jnp.float32):
    """Deterministic init mimicking nn.Linear default (U(-1/sqrt(fan_in), ...))."""
    k1, k2, k3, k4 = jax.random.split(key, 4)
    bound1 = 1.0 / (input_size ** 0.5)
    bound2 = 1.0 / (hidden_size ** 0.5)
    # Stored already transposed relative to PyTorch's [out, in] convention.
    w1 = jax.random.uniform(k1, (input_size, hidden_size), dtype, -bound1, bound1)
    b1 = jax.random.uniform(k2, (hidden_size,), dtype, -bound1, bound1)
    w2 = jax.random.uniform(k3, (hidden_size, hidden_size), dtype, -bound2, bound2)
    b2 = jax.random.uniform(k4, (hidden_size,), dtype, -bound2, bound2)
    return w1, b1, w2, b2


if __name__ == "__main__":
    B, S, F_IN, H = 2, 8, 4, 32

    key = jax.random.PRNGKey(0)
    kx, kp = jax.random.split(key)
    x = jax.random.normal(kx, (B, S, F_IN), dtype=jnp.float32)
    w1, b1, w2, b2 = init_params(kp, F_IN, H)

    # Pure-JAX reference.
    ref = jnp.maximum(x.reshape(-1, F_IN) @ w1 + b1, 0.0) @ w2 + b2
    ref = ref.reshape(B, S, H)

    # f32 MXU operands: bit-accurate path.
    out = jax.block_until_ready(encoder_forward(x, w1, b1, w2, b2))
    assert out.shape == (B, S, H)
    assert jnp.allclose(out, ref, atol=1e-5, rtol=1e-5)

    # bf16 MXU operands (HBM / MXU fast path); loose tolerance vs f32 reference.
    out_bf16 = jax.block_until_ready(
        encoder_forward(x, w1, b1, w2, b2, matmul_dtype=jnp.bfloat16))
    assert out_bf16.shape == (B, S, H)
    assert jnp.allclose(out_bf16, ref, atol=5e-2, rtol=5e-2)

    print("KERNEL_OK")
</pallas_src>

<mosaic_0001>
module attributes {stable_mosaic.version = 11 : i64} {
  func.func @encoder_kernel(%arg0: i32, %arg1: memref<8x4xf32, #tpu.memory_space<vmem>>, %arg2: memref<4x128xf32, #tpu.memory_space<vmem>>, %arg3: memref<1x128xf32, #tpu.memory_space<vmem>>, %arg4: memref<128x128xf32, #tpu.memory_space<vmem>>, %arg5: memref<1x128xf32, #tpu.memory_space<vmem>>, %arg6: memref<8x128xf32, #tpu.memory_space<vmem>>) attributes {dimension_semantics = [#tpu.dimension_semantics<parallel>], iteration_bounds = array<i64: 2>, scalar_prefetch = 0 : i64, scratch_operands = 0 : i64, tpu.core_type = #tpu.core_type<tc>, window_params = [{transform_indices = @transform_0, window_bounds = array<i64: 8, 4>}, {pipeline_mode = #tpu.pipeline_mode<synchronous>, transform_indices = @transform_1, window_bounds = array<i64: 4, 128>}, {pipeline_mode = #tpu.pipeline_mode<synchronous>, transform_indices = @transform_2, window_bounds = array<i64: 1, 128>}, {pipeline_mode = #tpu.pipeline_mode<synchronous>, transform_indices = @transform_3, window_bounds = array<i64: 128, 128>}, {pipeline_mode = #tpu.pipeline_mode<synchronous>, transform_indices = @transform_4, window_bounds = array<i64: 1, 128>}, {transform_indices = @transform_5, window_bounds = array<i64: 8, 128>}]} {
    %c0 = arith.constant 0 : index
    %c0_0 = arith.constant 0 : index
    %0 = vector.load %arg1[%c0, %c0_0] : memref<8x4xf32, #tpu.memory_space<vmem>>, vector<8x4xf32>
    %c0_1 = arith.constant 0 : index
    %c0_2 = arith.constant 0 : index
    %1 = vector.load %arg2[%c0_1, %c0_2] : memref<4x128xf32, #tpu.memory_space<vmem>>, vector<4x128xf32>
    %cst = arith.constant dense<0.000000e+00> : vector<8x128xf32>
    %2 = tpu.matmul %0, %1, %cst {dimension_numbers = #tpu.dot_dimension_numbers<[1], [0], [0], [1], [0, 0, 1, 1], [], []>} : vector<8x4xf32>, vector<4x128xf32>, vector<8x128xf32> -> vector<8x128xf32>
    %c0_3 = arith.constant 0 : index
    %c0_4 = arith.constant 0 : index
    %3 = vector.load %arg3[%c0_3, %c0_4] : memref<1x128xf32, #tpu.memory_space<vmem>>, vector<1x128xf32>
    %4 = vector.broadcast %3 : vector<1x128xf32> to vector<8x128xf32>
    %5 = arith.addf %2, %4 : vector<8x128xf32>
    %cst_5 = arith.constant 0.000000e+00 : f32
    %6 = vector.broadcast %cst_5 : f32 to vector<8x128xf32>
    %7 = arith.maximumf %5, %6 : vector<8x128xf32>
    %c0_6 = arith.constant 0 : index
    %c0_7 = arith.constant 0 : index
    %8 = vector.load %arg4[%c0_6, %c0_7] : memref<128x128xf32, #tpu.memory_space<vmem>>, vector<128x128xf32>
    %cst_8 = arith.constant dense<0.000000e+00> : vector<8x128xf32>
    %9 = tpu.matmul %7, %8, %cst_8 {dimension_numbers = #tpu.dot_dimension_numbers<[1], [0], [0], [1], [0, 0, 1, 1], [], []>} : vector<8x128xf32>, vector<128x128xf32>, vector<8x128xf32> -> vector<8x128xf32>
    %c0_9 = arith.constant 0 : index
    %c0_10 = arith.constant 0 : index
    %10 = vector.load %arg5[%c0_9, %c0_10] : memref<1x128xf32, #tpu.memory_space<vmem>>, vector<1x128xf32>
    %11 = vector.broadcast %10 : vector<1x128xf32> to vector<8x128xf32>
    %12 = arith.addf %9, %11 : vector<8x128xf32>
    %c0_11 = arith.constant 0 : index
    %c0_12 = arith.constant 0 : index
    %13 = vector.load %arg6[%c0_11, %c0_12] : memref<8x128xf32, #tpu.memory_space<vmem>>, vector<8x128xf32>
    tpu.vector_store %arg6[%c0_11, %c0_12], %12 {strides = array<i32>} : memref<8x128xf32, #tpu.memory_space<vmem>>, vector<8x128xf32>,
    return
  }
  func.func @transform_0(%arg0: i32) -> (i32, i32) {
    %c0_i32 = arith.constant 0 : i32
    %c0_i32_0 = arith.constant 0 : i32
    return %arg0, %c0_i32 : i32, i32
  }
  func.func @transform_1(%arg0: i32) -> (i32, i32) {
    %c0_i32 = arith.constant 0 : i32
    %c0_i32_0 = arith.constant 0 : i32
    %c0_i32_1 = arith.constant 0 : i32
    return %c0_i32, %c0_i32_0 : i32, i32
  }
  func.func @transform_2(%arg0: i32) -> (i32, i32) {
    %c0_i32 = arith.constant 0 : i32
    %c0_i32_0 = arith.constant 0 : i32
    %c0_i32_1 = arith.constant 0 : i32
    return %c0_i32, %c0_i32_0 : i32, i32
  }
  func.func @transform_3(%arg0: i32) -> (i32, i32) {
    %c0_i32 = arith.constant 0 : i32
    %c0_i32_0 = arith.constant 0 : i32
    %c0_i32_1 = arith.constant 0 : i32
    return %c0_i32, %c0_i32_0 : i32, i32
  }
  func.func @transform_4(%arg0: i32) -> (i32, i32) {
    %c0_i32 = arith.constant 0 : i32
    %c0_i32_0 = arith.constant 0 : i32
    %c0_i32_1 = arith.constant 0 : i32
    return %c0_i32, %c0_i32_0 : i32, i32
  }
  func.func @transform_5(%arg0: i32) -> (i32, i32) {
    %c0_i32 = arith.constant 0 : i32
    %c0_i32_0 = arith.constant 0 : i32
    return %arg0, %c0_i32 : i32, i32
  }
}

</mosaic_0001>

<bundles_post_ra>
// kernel: tpu_custom_call.1
= control target key start
LH: loop header
LB: loop body
LE: loop exit
PB: predicated region body
PF: predicated region fallthrough
CT: control target
= control target key end

     0   :  { %10 = vsyncpa [#allocation3], 0  ;;  %s933_s0 = inlined_call_operand.vmem [shape: f32[16,4], index: 0, kind: input, shape index: {}]   ;;  %s934_s1 = inlined_call_operand.vmem [shape: f32[4,128], index: 1, kind: input, shape index: {}]   ;;  %s935_s2 = inlined_call_operand.vmem [shape: f32[1,128], index: 2, kind: input, shape index: {}]   ;;  %s936_s3 = inlined_call_operand.hbm [shape: f32[128,128], index: 3, kind: input, shape index: {}]   ;;  %s937_s4 = inlined_call_operand.vmem [shape: f32[1,128], index: 4, kind: input, shape index: {}]   ;;  %s938_s5 = inlined_call_operand.hbm [shape: f32[16,128], index: 5, kind: output, shape index: {}]  }
   0x1   :  { %11 = vsyncpa [#allocation4], 0 }
   0x2   :  { %13 = vsyncpa [#allocation4 + $0x1], 0  ;;  %s789_s18 = smov 0   ;;  %s791_s19 = smov 0  }
   0x3   :  { %s793_s20 = smov 0   ;;  %s795_s21 = smov 0  }
   0x4 LB: > { %s810_s22 = sadd.s32 4294967295, %s750_s21   ;;  %s502_s23 = sadd.s32 4294967294, %s750_s21   ;;  %s750_s21 = sphi %s795_s21, %s954_s21   ;;  %s746_s20 = sphi %s793_s20, %s953_s20   ;;  %s742_s19 = sphi %s791_s19, %s952_s19   ;;  %s738_s18 = sphi %s789_s18, %s951_s18  }
   0x5   : > { %s814_s24 = sadd.s32 1, %s750_s21   ;;  %s136_s25 = sadd.s32 1, %s746_s20 }
   0x6   : > { %s133_s26 = ssub.s32 %s750_s21, %s814_s24  ;;  %p146_p0 = scmp.ne.s32.totalorder %s746_s20, %s742_s19 }
   0x7   : > { %p134_p1 = scmp.eq.s32.totalorder %s133_s26, 0  ;;  %p147_p2 = scmp.eq.s32.totalorder %s810_s22, 1 }
   0x8   : > { %p152_p3 = scmp.ne.s32.totalorder %s742_s19, %s738_s18  ;;  %p153_p4 = scmp.eq.s32.totalorder %s502_s23, 1 }
   0x9   : > { %s825_s27 = scalar_select %p134_p1, %s746_s20, %s136_s25  }
   0xa   : > { %p827_p5 = por %p147_p2, %p146_p0  ;;  %p831_p6 = por %p153_p4, %p152_p3 }
   0xb   : > { %p503_p7 = scmp.ge.s32.totalorder %s750_s21, 1  ;;  %p160_p8 = scmp.lt.s32.totalorder %s750_s21, 3 }
   0xc   : > { %s942_s28 = scalar_select %p827_p5, 1, 0 }
   0xd   : > { %s943_s29 = scalar_select %p831_p6, 1, 0 }
   0xe   : > { %p939_p9 = scmp.eq.s32.totalorder %s810_s22, 0  ;;  %p838_p10 = pnand %p503_p7, %p160_p8 }
   0xf   : > { %s752_s6 = smov [#allocation2]   ;;  %s656_s11 = scalar_lea.hbm %s936_s3, 2048 }
  0x10   : > { %s944_s30 = scalar_select %p838_p10, 1, 0 }
  0x11   : > { %s178_s7 = sshll.u32 %s752_s6, 4  ;;  %p607_p11 = pneg %p838_p10  ;;  %s179_s7 = int_to_ptr.vmem [resolvable:$true] %s178_s7 }
  0x12   : > { %p657_p13 = scmp.ne.s32.totalorder %s936_s3, %s656_s11  ;;  %p663_p3 = scmp.lt.u32.totalorder %s656_s11, %s936_s3 }
  0x13   : > { %p846_p12 = pnand %p939_p9, %p607_p11 }
  0x15   : > { %p658_p0 = pneg %p846_p12 }
  0x17   : > { %p659_p1 = pnand %p658_p0, %p657_p13 }
  0x19   : > { %p660_p2 = pneg %p659_p1 }
  0x1b   : > { %p665_p4 = pnand %p663_p3, %p660_p2 }
  0x1d   : > { %668 = shalt.err (!%p665_p4)
}
  0x1e   : > { %s669_s16 = scalar_lea.vmem %s179_s7, 2048  ;;  %p677_p9 = scmp.lt.s32.totalorder %s179_s7, %s179_s7 }
  0x1f   : > { %p670_p7 = scmp.ne.s32.totalorder %s179_s7, %s669_s16  ;;  %p678_p6 = scmp.lt.s32.totalorder %s669_s16, %s669_s16 }
  0x21   : > { %p672_p8 = pnand %p670_p7, %p658_p0  ;;  %p679_p5 = por %p678_p6, %p677_p9 }
  0x23   : > { %p673_p11 = pneg %p672_p8 }
  0x25   : > { %p680_p10 = pnand %p679_p5, %p673_p11 }
  0x27   : > { %683 = shalt.err (!%p680_p10)
}
  0x28   : > { %s753_s17 = smov 128   ;;  %s754_s23 = smov 8  }
  0x29   : > { %610 = dma.hbm_to_vmem [thread:$0]  (!%p846_p12), %s936_s3, 2048, %s179_s7, [#allocation3], %s753_s17, %s753_s17, %s754_s23  }
  0x2a   : > { %p946_p13 = scmp.ne.s32.totalorder %s944_s30, 0 }
  0x2b   : > { %p947_p1 = scmp.eq.s32.totalorder (!%p946_p13), %s810_s22, 0 }
  0x2c   : > { %204 = sbr.rel (%p946_p13) target bundleno = 503 (0x1f7), region = 40 }
  0x33   : > { %729 = dma.done.wait (%p947_p1), [#allocation3], 2048   ;;  %p948_p0 = pmov %p947_p1 }
  0x34   : > { %p231_p5 = scmp.lt.s32.totalorder %s810_s22, 1  ;;  %v755_v0 = vmov 0.0   ;;  %vm756_vm0 = vmmov 0   ;;  %v757_v1 = vmov 0.0|0.0   ;;  %vm248_vm1 = vcmask 1043456   ;;  %v323_v4 = vld [vmem:[#allocation2] sm:$0xff] }
  0x35   : > { %731 = vsyncadd (%p948_p0), [#allocation3], 4294965248  ;;  %537 = vmatprep.subr.mxu0 %v755_v0  ;;  %539 = vmatprep.mubr.msk.f32.mxu0 %vm756_vm0, %v755_v0  ;;  %vm244_vm2 = vcmask 31744   ;;  %v236_v2 = vld [vmem:[%s934_s1] sm:$0xf]  ;;  %v324_v5 = vld [vmem:[#allocation2 + $0x8] sm:$0xff] }
  0x36   : > { %s232_s6 = scalar_select %p231_p5, %s810_s22, 1  ;;  %577 = vmatprep.subr.bf16.mxu1 %v757_v1  ;;  %574 = vmatprep.mubr.msk.f32.mxu1 %vm756_vm0, %v755_v0  ;;  %v325_v6 = vld [vmem:[#allocation2 + $0x10] sm:$0xff]  ;;  %v326_v7 = vld [vmem:[#allocation2 + $0x18] sm:$0xff]  ;;  %v578_v8 = vpack.c.bf16 %v324_v5, %v323_v4  ;;  %v327_v10 = vld [vmem:[#allocation2 + $0x20] sm:$0xff] }
  0x37   : > { %538 = vmatpush3.msk.msra.mxu0 %vm248_vm1, %v236_v2  ;;  %v581_v9 = vpack.c.bf16 %v326_v7, %v325_v6  ;;  %v328_v11 = vld [vmem:[#allocation2 + $0x28] sm:$0xff]  ;;  %v329_v13 = vld [vmem:[#allocation2 + $0x30] sm:$0xff]  ;;  %v330_v14 = vld [vmem:[#allocation2 + $0x38] sm:$0xff]  ;;  %s228_s14 = sand.u32 1, %s742_s19   ;;  %s515_s23 = sshll.u32 %s810_s22, 7 }
  0x38   : > { %s509_s7 = sshll.u32 %s232_s6, 3  ;;  %579 = vmatpush3.bf16.msra.mxu1 %v578_v8  ;;  %v584_v12 = vpack.c.bf16 %v328_v11, %v327_v10  ;;  %v587_v15 = vpack.c.bf16 %v330_v14, %v329_v13  ;;  %v331_v16 = vld [vmem:[#allocation2 + $0x40] sm:$0xff]  ;;  %v332_v17 = vld [vmem:[#allocation2 + $0x48] sm:$0xff]  ;;  %v333_v19 = vld [vmem:[#allocation2 + $0x50] sm:$0xff]  ;;  %s508_s15 = sshll.u32 %s228_s14, 3 }
  0x39   : > { %s234_s9 = scalar_lea.vmem %s933_s0, %s509_s7  ;;  %580 = vmatprep.subr.bf16.mxu1 %v757_v1  ;;  %v590_v18 = vpack.c.bf16 %v332_v17, %v331_v16  ;;  %v334_v20 = vld [vmem:[#allocation2 + $0x58] sm:$0xff]  ;;  %v335_v22 = vld [vmem:[#allocation2 + $0x60] sm:$0xff]  ;;  %v336_v23 = vld [vmem:[#allocation2 + $0x68] sm:$0xff]  ;;  %s230_s25 = scalar_lea.vmem [#allocation5], %s508_s15 }
  0x3a   : > { %v235_v3 = vld [vmem:[%s234_s9] sm:$0xff]  ;;  %v593_v21 = vpack.c.bf16 %v334_v20, %v333_v19  ;;  %v596_v24 = vpack.c.bf16 %v336_v23, %v335_v22  ;;  %v337_v25 = vld [vmem:[#allocation2 + $0x70] sm:$0xff]  ;;  %v338_v26 = vld [vmem:[#allocation2 + $0x78] sm:$0xff]  ;;  %s431_s26 = sshll.u32 %s230_s25, 4  ;;  %s891_s30 = scalar_lea.hbm %s938_s5, %s515_s23  ;;  %s893_s26 = int_to_ptr.vmem [resolvable:$true] %s431_s26 }
  0x3b   : > { %540 = vmatmul.mubr.msk.f32.vlgmr.msra.gmra.mrb[0].mxu0 %vm244_vm2, %v235_v3  ;;  %v599_v27 = vpack.c.bf16 %v338_v26, %v337_v25  ;;  %v510_v28 = vld [vmem:[%s935_s2] ss:$0 sm:$0xff]  ;;  %s418_s8 = scalar_lea.sflag [#allocation4], %s228_s14  ;;  %s684_s9 = scalar_lea.vmem %s893_s26, 128 }
  0x3c   : > { %582 = vmatpush3.bf16.msra.mxu1 %v581_v9  ;;  %v513_v33 = vld [vmem:[%s937_s4] ss:$0 sm:$0xff]  ;;  %p685_p6 = scmp.ne.s32.totalorder %s893_s26, %s684_s9  ;;  %p949_p9 = scmp.ne.s32.totalorder %s942_s28, 0 }
  0x3d   : > { %583 = vmatprep.subr.bf16.mxu1 %v757_v1  ;;  %s758_s22 = smov [#allocation5]  }
  0x3e   : > { %p686_p10 = pnand %p685_p6, %p949_p9  ;;  %s688_s10 = sshll.u32 %s758_s22, 4  ;;  %s689_s10 = int_to_ptr.vmem [resolvable:$false] %s688_s10 }
  0x3f   : > { %s690_s11 = scalar_lea.vmem %s689_s10, 256  ;;  %p691_p2 = scmp.lt.s32.totalorder %s893_s26, %s689_s10 }
  0x40   : > { %585 = vmatpush3.bf16.msra.mxu1 %v584_v12  ;;  %p687_p12 = pneg %p686_p10  ;;  %p692_p3 = scmp.lt.s32.totalorder %s690_s11, %s684_s9 }
  0x41   : > { %586 = vmatprep.subr.bf16.mxu1 %v757_v1 }
  0x42   : > { %p693_p4 = por %p692_p3, %p691_p2 }
  0x44   : > { %588 = vmatpush3.bf16.msra.mxu1 %v587_v15  ;;  %p694_p7 = pnand %p693_p4, %p687_p12 }
  0x45   : > { %589 = vmatprep.subr.bf16.mxu1 %v757_v1 }
  0x48   : > { %591 = vmatpush3.bf16.msra.mxu1 %v590_v18 }
  0x49   : > { %592 = vmatprep.subr.bf16.mxu1 %v757_v1 }
  0x4c   : > { %594 = vmatpush3.bf16.msra.mxu1 %v593_v21 }
  0x4d   : > { %595 = vmatprep.subr.bf16.mxu1 %v757_v1 }
  0x50   : > { %597 = vmatpush3.bf16.msra.mxu1 %v596_v24 }
  0x51   : > { %598 = vmatprep.subr.bf16.mxu1 %v757_v1 }
  0x54   : > { %600 = vmatpush3.bf16.msra.mxu1 %v599_v27 }
 0x10e   : > { %v318_v29 = vpop.f32.mrb[0].mxu0 }
 0x10f   : > { %v319_v30 = vadd.f32 %v510_v28, %v318_v29  ;;  %v541_v31 = vpop.f32.mrb[1].mxu0 }
 0x111   : > { %v322_v32 = vmax.f32 %v319_v30, 0.0 }
 0x113   : > { %575 = vmatmul.mubr.f32.vlgmr.msra.gmra.mrb[0].mxu1 %v322_v32 }
 0x1e6   : > { %v412_v34 = vpop.f32.mrb[0].mxu1 }
 0x1e7   : > { %v413_v35 = vadd.f32 %v513_v33, %v412_v34  ;;  %v576_v36 = vpop.f32.mrb[1].mxu1 }
 0x1e9   : > { %416 = vst [vmem:[%s230_s25] sm:$0xff] %v413_v35 }
 0x1ea   : > { %697 = shalt.err (!%p694_p7)
}
 0x1eb   : > { %s698_s12 = scalar_lea.hbm %s891_s30, 128  ;;  %s702_s15 = scalar_lea.hbm %s938_s5, 256 }
 0x1ec   : > { %p699_p8 = scmp.ne.s32.totalorder %s891_s30, %s698_s12  ;;  %p703_p1 = scmp.lt.u32.totalorder %s891_s30, %s938_s5 }
 0x1ed   : > { %p704_p0 = scmp.lt.u32.totalorder %s702_s15, %s698_s12  ;;  %p706_p6 = scmp.lt.u32.totalorder %s698_s12, %s891_s30 }
 0x1ee   : > { %p700_p11 = pnand %p699_p8, %p949_p9 }
 0x1ef   : > { %p705_p5 = por %p704_p0, %p703_p1 }
 0x1f0   : > { %p701_p13 = pneg %p700_p11 }
 0x1f1   : > { %p707_p10 = por %p706_p6, %p705_p5 }
 0x1f3   : > { %p708_p12 = pnand %p707_p10, %p701_p13 }
 0x1f5   : > { %711 = shalt.err (!%p708_p12)
}
 0x1f6   : > { %605 = dma.vmem_to_hbm [thread:$0]  (%p949_p9), %s893_s26, 128, %s891_s30, %s418_s8  }
 0x1f7 PF: > { %p617_p2 = scmp.ge.s32.totalorder %s750_s21, 2  ;;  %s443_s23 = sand.u32 1, %s738_s18  }
 0x1f8   : > { %p950_p3 = scmp.ne.s32.totalorder %s943_s29, 0  ;;  %s444_s25 = scalar_lea.sflag [#allocation4], %s443_s23 }
 0x1fa   : > { %p612_p4 = pnand %p617_p2, %p950_p3 }
 0x1fc   : > { %733 = dma.done.wait (!%p612_p4), %s444_s25, 128  }
 0x1fd   : > { %735 = vsyncadd (!%p612_p4), %s444_s25, 4294967168  ;;  %p16_p7 = scmp.ge.s32.totalorder %s814_s24, 4   ;;  %s951_s18 = smov %s742_s19 }
 0x1fe   : > { %s952_s19 = smov %s746_s20  ;;  %s953_s20 = smov %s825_s27 }
 0x1ff   : > { %s954_s21 = smov %s814_s24  ;;  %18 = sbr.rel (!%p16_p7) target bundleno = 4 (0x4), region = 80 }
 0x206   :  { %449 = vsyncpa [#allocation3], 1 }
 0x207   :  { %451 = vsyncpa [#allocation3 + $0x1], 1 }
 0x208   :  { %452 = vsyncpa [#allocation4], 1 }
 0x209   :  { %454 = vsyncpa [#allocation4 + $0x1], 1 }

</bundles_post_ra>
